<compile_context>
chip_gen: v7x
topology: tpu7x:2x2x1
jax: 0.10.0
libtpu: 0.0.40
codegen_flags: <defaults>
</compile_context>

<pallas_src>
import functools

import numpy as np
import jax
import jax.numpy as jnp
from jax.experimental import pallas as pl
from jax.experimental.pallas import tpu as pltpu

EPSILON = 1e-06          # unused by forward(); kept for parity with the spec
LOG_STD_MAX = 2.0
LOG_STD_MIN = -5.0

LANE = 128               # TPU lane width; output/hidden lane dims padded to this


def _round_up(n, m):
    return ((n + m - 1) // m) * m


def _pick_tm(batch, tm_max=1024):
    """Batch tile: single block for small B; for large B use big tiles that are
    multiples of 256 and give >= 2 grid steps (shards across v7x's 2 TCs)."""
    b8 = _round_up(batch, 8)
    if b8 <= 256:
        return b8
    return min(tm_max, max(256, _round_up((b8 + 1) // 2, 256)))


def actor_fused_kernel(x_ref, w1_ref, b1_ref, w2_ref, b2_ref, wh_ref, bh_ref,
                       lo_ref, hi_ref, out_ref):
    # hidden layer 1: Linear + ReLU   (bf16 operands, f32 accumulate)
    h = jnp.dot(x_ref[...], w1_ref[...], preferred_element_type=jnp.float32)
    h = jnp.maximum(h + b1_ref[...], 0.0)
    # hidden layer 2: Linear + ReLU
    h = jnp.dot(h.astype(jnp.bfloat16), w2_ref[...],
                preferred_element_type=jnp.float32)
    h = jnp.maximum(h + b2_ref[...], 0.0)
    # fused heads: one matmul producing [mu | log_std | pad] on the lane axis
    out = jnp.dot(h.astype(jnp.bfloat16), wh_ref[...],
                  preferred_element_type=jnp.float32)
    out = out + bh_ref[...]
    # per-column clamp: lo/hi are (-inf,+inf) for mu columns and
    # (LOG_STD_MIN, LOG_STD_MAX) for log_std columns -> 2 VPU ops total
    out = jnp.minimum(jnp.maximum(out, lo_ref[...]), hi_ref[...])
    out_ref[...] = out.astype(out_ref.dtype)


def _vmem_budget_bytes(tm, state_dim, a2_pad, params):
    def nbytes(a):
        return a.size * a.dtype.itemsize
    per_step = tm * state_dim * 2 + tm * a2_pad * 4          # x tile + out tile
    resident = sum(nbytes(v) for v in params.values())
    # every input still gets 2 pipeline buffers, even with constant index maps
    total = 2 * (per_step + resident) + (4 << 20)
    return int(min(total, 64 << 20))


@functools.partial(jax.jit, static_argnames=("action_dim",))
def actor_forward(state, params, *, action_dim):
    """Fused forward. state: (B, state_dim) f32. Returns (mu, log_std) f32."""
    B, state_dim = state.shape
    h_pad = params["w1"].shape[1]
    a2_pad = params["wh"].shape[1]
    assert a2_pad >= 2 * action_dim, "action_dim mismatch vs packed head layout"

    tm = _pick_tm(B)
    b_pad = _round_up(B, tm)
    grid = (b_pad // tm,)

    # cast to bf16 (halves input DMA); pad only the batch rows if needed
    x = state.astype(jnp.bfloat16)
    if b_pad != B:
        x = jnp.zeros((b_pad, state_dim), jnp.bfloat16).at[:B].set(x)

    out = pl.pallas_call(
        actor_fused_kernel,
        out_shape=jax.ShapeDtypeStruct((b_pad, a2_pad), jnp.float32),
        grid_spec=pltpu.PrefetchScalarGridSpec(
            num_scalar_prefetch=0,
            grid=grid,
            in_specs=[
                # activations: tiled along the batch grid, natural feature width
                pl.BlockSpec((tm, state_dim), lambda i: (i, 0)),
                # weights / biases / clamp rows: constant index map -> resident
                pl.BlockSpec(params["w1"].shape, lambda i: (0, 0)),
                pl.BlockSpec(params["b1"].shape, lambda i: (0, 0)),
                pl.BlockSpec(params["w2"].shape, lambda i: (0, 0)),
                pl.BlockSpec(params["b2"].shape, lambda i: (0, 0)),
                pl.BlockSpec(params["wh"].shape, lambda i: (0, 0)),
                pl.BlockSpec(params["bh"].shape, lambda i: (0, 0)),
                pl.BlockSpec(params["lo"].shape, lambda i: (0, 0)),
                pl.BlockSpec(params["hi"].shape, lambda i: (0, 0)),
            ],
            out_specs=pl.BlockSpec((tm, a2_pad), lambda i: (i, 0)),
        ),
        compiler_params=pltpu.CompilerParams(
            dimension_semantics=("parallel",),
            vmem_limit_bytes=_vmem_budget_bytes(tm, state_dim, a2_pad, params)),
    )(x, params["w1"], params["b1"], params["w2"], params["b2"],
      params["wh"], params["bh"], params["lo"], params["hi"])

    mu = out[:B, :action_dim]
    log_std = out[:B, action_dim:2 * action_dim]
    return mu, log_std


def init_params(key, state_dim, action_dim, hidden_dim):
    """Init matching SquashedGaussianActor.__init__ (orthogonal gains, biases),
    packed for the kernel: weights transposed to (in, out), heads fused, hidden/
    output lane dims zero-padded to 128, matmul weights cast to bf16, plus
    per-column clamp rows.  Returns (packed_params, unpadded_f32_ref_params)."""
    k1, k2, k3, k4 = jax.random.split(key, 4)
    ortho = jax.nn.initializers.orthogonal
    gain = np.sqrt(2.0)
    # PyTorch Linear weight is (out, in); orthogonal_ applied to that shape.
    w1 = ortho(scale=gain)(k1, (hidden_dim, state_dim), jnp.float32).T
    w2 = ortho(scale=gain)(k2, (hidden_dim, hidden_dim), jnp.float32).T
    wmu = ortho(scale=0.01)(k3, (action_dim, hidden_dim), jnp.float32).T
    wls = ortho(scale=0.01)(k4, (action_dim, hidden_dim), jnp.float32).T
    log_std_mean = (LOG_STD_MIN + LOG_STD_MAX) / 2.0

    h_pad = _round_up(hidden_dim, LANE)
    a2_pad = _round_up(2 * action_dim, LANE)

    def pad2(a, rows, cols):
        return jnp.zeros((rows, cols), a.dtype).at[:a.shape[0], :a.shape[1]].set(a)

    # fused heads: [ mu | log_std ] along the output (lane) axis
    wh = jnp.concatenate([wmu, wls], axis=1)                       # (H, 2A)
    bh = jnp.concatenate(
        [jnp.zeros((1, action_dim), jnp.float32),
         jnp.full((1, action_dim), log_std_mean, jnp.float32)], axis=1)

    # per-column clamp bounds: only the log_std columns get finite limits
    lo = np.full((1, a2_pad), -np.inf, np.float32)
    hi = np.full((1, a2_pad), np.inf, np.float32)
    lo[0, action_dim:2 * action_dim] = LOG_STD_MIN
    hi[0, action_dim:2 * action_dim] = LOG_STD_MAX

    packed = {
        # w1 keeps its natural (state_dim) contraction rows -- no zero-row DMA
        "w1": pad2(w1, state_dim, h_pad).astype(jnp.bfloat16),
        "b1": jnp.zeros((1, h_pad), jnp.float32),
        "w2": pad2(w2, h_pad, h_pad).astype(jnp.bfloat16),
        "b2": jnp.zeros((1, h_pad), jnp.float32),
        "wh": pad2(wh, h_pad, a2_pad).astype(jnp.bfloat16),
        "bh": pad2(bh, 1, a2_pad),
        "lo": jnp.asarray(lo),
        "hi": jnp.asarray(hi),
    }
    ref = {
        "w1": w1, "b1": jnp.zeros((1, hidden_dim), jnp.float32),
        "w2": w2, "b2": jnp.zeros((1, hidden_dim), jnp.float32),
        "wmu": wmu, "bmu": jnp.zeros((1, action_dim), jnp.float32),
        "wls": wls, "bls": jnp.full((1, action_dim), log_std_mean, jnp.float32),
    }
    return packed, ref


def actor_forward_ref(state, p):
    """Pure-JAX f32 reference for correctness check."""
    h = jnp.maximum(state @ p["w1"] + p["b1"], 0.0)
    h = jnp.maximum(h @ p["w2"] + p["b2"], 0.0)
    mu = h @ p["wmu"] + p["bmu"]
    ls = jnp.clip(h @ p["wls"] + p["bls"], LOG_STD_MIN, LOG_STD_MAX)
    return mu, ls


if __name__ == "__main__":
    # TODO(synk): sample()/deterministic_act() (rsample + tanh + log_prob + debug
    # prints) are stochastic / host-side paths; only forward() is implemented here.
    batch, state_dim, action_dim, hidden_dim = 8, 16, 8, 32

    key = jax.random.PRNGKey(0)
    pk, xk = jax.random.split(key)
    params, ref_params = init_params(pk, state_dim, action_dim, hidden_dim)
    state = jax.random.normal(xk, (batch, state_dim), jnp.float32)

    mu, log_std = jax.block_until_ready(
        actor_forward(state, params, action_dim=action_dim))
    mu_ref, ls_ref = actor_forward_ref(state, ref_params)

    assert mu.shape == (batch, action_dim) and log_std.shape == (batch, action_dim)
    # bf16 matmul path vs f32 reference -> loosened tolerance
    np.testing.assert_allclose(np.asarray(mu), np.asarray(mu_ref),
                               rtol=1e-2, atol=1e-2)
    np.testing.assert_allclose(np.asarray(log_std), np.asarray(ls_ref),
                               rtol=1e-2, atol=1e-2)
    print("KERNEL_OK")
</pallas_src>

<mosaic_0001>
module attributes {stable_mosaic.version = 11 : i64} {
  func.func @actor_fused_kernel(%arg0: i32, %arg1: memref<8x16xbf16, #tpu.memory_space<vmem>>, %arg2: memref<16x128xbf16, #tpu.memory_space<vmem>>, %arg3: memref<1x128xf32, #tpu.memory_space<vmem>>, %arg4: memref<128x128xbf16, #tpu.memory_space<vmem>>, %arg5: memref<1x128xf32, #tpu.memory_space<vmem>>, %arg6: memref<128x128xbf16, #tpu.memory_space<vmem>>, %arg7: memref<1x128xf32, #tpu.memory_space<vmem>>, %arg8: memref<1x128xf32, #tpu.memory_space<vmem>>, %arg9: memref<1x128xf32, #tpu.memory_space<vmem>>, %arg10: memref<8x128xf32, #tpu.memory_space<vmem>>) attributes {dimension_semantics = [#tpu.dimension_semantics<parallel>], iteration_bounds = array<i64: 1>, scalar_prefetch = 0 : i64, scratch_operands = 0 : i64, tpu.core_type = #tpu.core_type<tc>, window_params = [{transform_indices = @transform_0, window_bounds = array<i64: 8, 16>}, {pipeline_mode = #tpu.pipeline_mode<synchronous>, transform_indices = @transform_1, window_bounds = array<i64: 16, 128>}, {pipeline_mode = #tpu.pipeline_mode<synchronous>, transform_indices = @transform_2, window_bounds = array<i64: 1, 128>}, {pipeline_mode = #tpu.pipeline_mode<synchronous>, transform_indices = @transform_3, window_bounds = array<i64: 128, 128>}, {pipeline_mode = #tpu.pipeline_mode<synchronous>, transform_indices = @transform_4, window_bounds = array<i64: 1, 128>}, {pipeline_mode = #tpu.pipeline_mode<synchronous>, transform_indices = @transform_5, window_bounds = array<i64: 128, 128>}, {pipeline_mode = #tpu.pipeline_mode<synchronous>, transform_indices = @transform_6, window_bounds = array<i64: 1, 128>}, {pipeline_mode = #tpu.pipeline_mode<synchronous>, transform_indices = @transform_7, window_bounds = array<i64: 1, 128>}, {pipeline_mode = #tpu.pipeline_mode<synchronous>, transform_indices = @transform_8, window_bounds = array<i64: 1, 128>}, {transform_indices = @transform_9, window_bounds = array<i64: 8, 128>}]} {
    %c0 = arith.constant 0 : index
    %c0_0 = arith.constant 0 : index
    %0 = vector.load %arg1[%c0, %c0_0] : memref<8x16xbf16, #tpu.memory_space<vmem>>, vector<8x16xbf16>
    %c0_1 = arith.constant 0 : index
    %c0_2 = arith.constant 0 : index
    %1 = vector.load %arg2[%c0_1, %c0_2] : memref<16x128xbf16, #tpu.memory_space<vmem>>, vector<16x128xbf16>
    %cst = arith.constant dense<0.000000e+00> : vector<8x128xf32>
    %2 = tpu.matmul %0, %1, %cst {dimension_numbers = #tpu.dot_dimension_numbers<[1], [0], [0], [1], [0, 0, 1, 1], [], []>} : vector<8x16xbf16>, vector<16x128xbf16>, vector<8x128xf32> -> vector<8x128xf32>
    %c0_3 = arith.constant 0 : index
    %c0_4 = arith.constant 0 : index
    %3 = vector.load %arg3[%c0_3, %c0_4] : memref<1x128xf32, #tpu.memory_space<vmem>>, vector<1x128xf32>
    %4 = vector.broadcast %3 : vector<1x128xf32> to vector<8x128xf32>
    %5 = arith.addf %2, %4 : vector<8x128xf32>
    %cst_5 = arith.constant 0.000000e+00 : f32
    %6 = vector.broadcast %cst_5 : f32 to vector<8x128xf32>
    %7 = arith.maximumf %5, %6 : vector<8x128xf32>
    %8 = arith.truncf %7 : vector<8x128xf32> to vector<8x128xbf16>
    %c0_6 = arith.constant 0 : index
    %c0_7 = arith.constant 0 : index
    %9 = vector.load %arg4[%c0_6, %c0_7] : memref<128x128xbf16, #tpu.memory_space<vmem>>, vector<128x128xbf16>
    %cst_8 = arith.constant dense<0.000000e+00> : vector<8x128xf32>
    %10 = tpu.matmul %8, %9, %cst_8 {dimension_numbers = #tpu.dot_dimension_numbers<[1], [0], [0], [1], [0, 0, 1, 1], [], []>} : vector<8x128xbf16>, vector<128x128xbf16>, vector<8x128xf32> -> vector<8x128xf32>
    %c0_9 = arith.constant 0 : index
    %c0_10 = arith.constant 0 : index
    %11 = vector.load %arg5[%c0_9, %c0_10] : memref<1x128xf32, #tpu.memory_space<vmem>>, vector<1x128xf32>
    %12 = vector.broadcast %11 : vector<1x128xf32> to vector<8x128xf32>
    %13 = arith.addf %10, %12 : vector<8x128xf32>
    %cst_11 = arith.constant 0.000000e+00 : f32
    %14 = vector.broadcast %cst_11 : f32 to vector<8x128xf32>
    %15 = arith.maximumf %13, %14 : vector<8x128xf32>
    %16 = arith.truncf %15 : vector<8x128xf32> to vector<8x128xbf16>
    %c0_12 = arith.constant 0 : index
    %c0_13 = arith.constant 0 : index
    %17 = vector.load %arg6[%c0_12, %c0_13] : memref<128x128xbf16, #tpu.memory_space<vmem>>, vector<128x128xbf16>
    %cst_14 = arith.constant dense<0.000000e+00> : vector<8x128xf32>
    %18 = tpu.matmul %16, %17, %cst_14 {dimension_numbers = #tpu.dot_dimension_numbers<[1], [0], [0], [1], [0, 0, 1, 1], [], []>} : vector<8x128xbf16>, vector<128x128xbf16>, vector<8x128xf32> -> vector<8x128xf32>
    %c0_15 = arith.constant 0 : index
    %c0_16 = arith.constant 0 : index
    %19 = vector.load %arg7[%c0_15, %c0_16] : memref<1x128xf32, #tpu.memory_space<vmem>>, vector<1x128xf32>
    %20 = vector.broadcast %19 : vector<1x128xf32> to vector<8x128xf32>
    %21 = arith.addf %18, %20 : vector<8x128xf32>
    %c0_17 = arith.constant 0 : index
    %c0_18 = arith.constant 0 : index
    %22 = vector.load %arg8[%c0_17, %c0_18] : memref<1x128xf32, #tpu.memory_space<vmem>>, vector<1x128xf32>
    %23 = vector.broadcast %22 : vector<1x128xf32> to vector<8x128xf32>
    %24 = arith.maximumf %21, %23 : vector<8x128xf32>
    %c0_19 = arith.constant 0 : index
    %c0_20 = arith.constant 0 : index
    %25 = vector.load %arg9[%c0_19, %c0_20] : memref<1x128xf32, #tpu.memory_space<vmem>>, vector<1x128xf32>
    %26 = vector.broadcast %25 : vector<1x128xf32> to vector<8x128xf32>
    %27 = arith.minimumf %24, %26 : vector<8x128xf32>
    %c0_21 = arith.constant 0 : index
    %c0_22 = arith.constant 0 : index
    %28 = vector.load %arg10[%c0_21, %c0_22] : memref<8x128xf32, #tpu.memory_space<vmem>>, vector<8x128xf32>
    tpu.vector_store %arg10[%c0_21, %c0_22], %27 {strides = array<i32>} : memref<8x128xf32, #tpu.memory_space<vmem>>, vector<8x128xf32>,
    return
  }
  func.func @transform_0(%arg0: i32) -> (i32, i32) {
    %c0_i32 = arith.constant 0 : i32
    %c0_i32_0 = arith.constant 0 : i32
    return %arg0, %c0_i32 : i32, i32
  }
  func.func @transform_1(%arg0: i32) -> (i32, i32) {
    %c0_i32 = arith.constant 0 : i32
    %c0_i32_0 = arith.constant 0 : i32
    %c0_i32_1 = arith.constant 0 : i32
    return %c0_i32, %c0_i32_0 : i32, i32
  }
  func.func @transform_2(%arg0: i32) -> (i32, i32) {
    %c0_i32 = arith.constant 0 : i32
    %c0_i32_0 = arith.constant 0 : i32
    %c0_i32_1 = arith.constant 0 : i32
    return %c0_i32, %c0_i32_0 : i32, i32
  }
  func.func @transform_3(%arg0: i32) -> (i32, i32) {
    %c0_i32 = arith.constant 0 : i32
    %c0_i32_0 = arith.constant 0 : i32
    %c0_i32_1 = arith.constant 0 : i32
    return %c0_i32, %c0_i32_0 : i32, i32
  }
  func.func @transform_4(%arg0: i32) -> (i32, i32) {
    %c0_i32 = arith.constant 0 : i32
    %c0_i32_0 = arith.constant 0 : i32
    %c0_i32_1 = arith.constant 0 : i32
    return %c0_i32, %c0_i32_0 : i32, i32
  }
  func.func @transform_5(%arg0: i32) -> (i32, i32) {
    %c0_i32 = arith.constant 0 : i32
    %c0_i32_0 = arith.constant 0 : i32
    %c0_i32_1 = arith.constant 0 : i32
    return %c0_i32, %c0_i32_0 : i32, i32
  }
  func.func @transform_6(%arg0: i32) -> (i32, i32) {
    %c0_i32 = arith.constant 0 : i32
    %c0_i32_0 = arith.constant 0 : i32
    %c0_i32_1 = arith.constant 0 : i32
    return %c0_i32, %c0_i32_0 : i32, i32
  }
  func.func @transform_7(%arg0: i32) -> (i32, i32) {
    %c0_i32 = arith.constant 0 : i32
    %c0_i32_0 = arith.constant 0 : i32
    %c0_i32_1 = arith.constant 0 : i32
    return %c0_i32, %c0_i32_0 : i32, i32
  }
  func.func @transform_8(%arg0: i32) -> (i32, i32) {
    %c0_i32 = arith.constant 0 : i32
    %c0_i32_0 = arith.constant 0 : i32
    %c0_i32_1 = arith.constant 0 : i32
    return %c0_i32, %c0_i32_0 : i32, i32
  }
  func.func @transform_9(%arg0: i32) -> (i32, i32) {
    %c0_i32 = arith.constant 0 : i32
    %c0_i32_0 = arith.constant 0 : i32
    return %arg0, %c0_i32 : i32, i32
  }
}

</mosaic_0001>

<bundles_post_ra>
// kernel: actor_forward.1
= control target key start
LH: loop header
LB: loop body
LE: loop exit
PB: predicated region body
PF: predicated region fallthrough
CT: control target
= control target key end

     0   :  { %14 = vsyncpa [#allocation3], 0  ;;  %s654_s0 = inlined_call_operand.vmem [shape: bf16[8,16], index: 0, kind: input, shape index: {}]   ;;  %s655_s1 = inlined_call_operand.vmem [shape: bf16[16,128], index: 1, kind: input, shape index: {}]   ;;  %s656_s2 = inlined_call_operand.vmem [shape: f32[1,128], index: 2, kind: input, shape index: {}]   ;;  %s657_s3 = inlined_call_operand.hbm [shape: bf16[128,128], index: 3, kind: input, shape index: {}]   ;;  %s658_s4 = inlined_call_operand.vmem [shape: f32[1,128], index: 4, kind: input, shape index: {}]   ;;  %s659_s5 = inlined_call_operand.hbm [shape: bf16[128,128], index: 5, kind: input, shape index: {}]   ;;  %s660_s6 = inlined_call_operand.vmem [shape: f32[1,128], index: 6, kind: input, shape index: {}]   ;;  %s661_s7 = inlined_call_operand.vmem [shape: f32[1,128], index: 7, kind: input, shape index: {}]   ;;  %s662_s8 = inlined_call_operand.vmem [shape: f32[1,128], index: 8, kind: input, shape index: {}]   ;;  %s663_s9 = inlined_call_operand.vmem [shape: f32[8,128], index: 9, kind: output, shape index: {}]  }
   0x1   :  { %15 = vsyncpa [#allocation5], 0  ;;  %s530_s30 = smov [#allocation2]   ;;  %s482_s13 = scalar_lea.hbm %s657_s3, 1024 }
   0x2   :  { %s27_s10 = sshll.u32 %s530_s30, 4  ;;  %p483_p0 = scmp.ne.s32.totalorder %s657_s3, %s482_s13  ;;  %s28_s10 = int_to_ptr.vmem [resolvable:$true] %s27_s10 }
   0x3   :  { %p486_p1 = scmp.lt.u32.totalorder %s482_s13, %s657_s3 }
   0x5   :  { %p488_p2 = pnand %p486_p1, %p483_p0 }
   0x7   :  { %491 = shalt.err (!%p488_p2)
}
   0x8   :  { %s492_s18 = scalar_lea.vmem %s28_s10, 1024  ;;  %p497_p4 = scmp.lt.s32.totalorder %s28_s10, %s28_s10 }
   0x9   :  { %p493_p3 = scmp.ne.s32.totalorder %s28_s10, %s492_s18  ;;  %p498_p5 = scmp.lt.s32.totalorder %s492_s18, %s492_s18 }
   0xb   :  { %p499_p6 = por %p498_p5, %p497_p4 }
   0xd   :  { %p500_p7 = pnand %p499_p6, %p493_p3 }
   0xf   :  { %503 = shalt.err (!%p500_p7)
}
  0x10   :  { %s531_s19 = smov 64   ;;  %s532_s20 = smov 4  }
  0x11   :  { %33 = dma.hbm_to_vmem [thread:$0]  %s657_s3, 1024, %s28_s10, [#allocation3], %s531_s19, %s531_s19, %s532_s20  }
  0x12   :  { %s533_s23 = smov [#allocation4]   ;;  %s504_s27 = scalar_lea.hbm %s659_s5, 1024 }
  0x13   :  { %s41_s24 = sshll.u32 %s533_s23, 4  ;;  %p505_p8 = scmp.ne.s32.totalorder %s659_s5, %s504_s27  ;;  %s42_s24 = int_to_ptr.vmem [resolvable:$true] %s41_s24 }
  0x14   :  { %p508_p9 = scmp.lt.u32.totalorder %s504_s27, %s659_s5 }
  0x16   :  { %p510_p10 = pnand %p508_p9, %p505_p8 }
  0x18   :  { %513 = shalt.err (!%p510_p10)
}
  0x19   :  { %s514_s12 = scalar_lea.vmem %s42_s24, 1024  ;;  %p519_p12 = scmp.lt.s32.totalorder %s42_s24, %s42_s24 }
  0x1a   :  { %p515_p11 = scmp.ne.s32.totalorder %s42_s24, %s514_s12  ;;  %p520_p13 = scmp.lt.s32.totalorder %s514_s12, %s514_s12 }
  0x1c   :  { %p521_p0 = por %p520_p13, %p519_p12 }
  0x1e   :  { %p522_p1 = pnand %p521_p0, %p515_p11 }
  0x20   :  { %525 = shalt.err (!%p522_p1)
}
  0x21   :  { %47 = dma.hbm_to_vmem [thread:$0]  %s659_s5, 1024, %s42_s24, [#allocation5], %s531_s19, %s531_s19, %s532_s20  }
  0x22   :  { %526 = dma.done.wait [#allocation3], 1024  }
  0x23   :  { %527 = vsyncadd [#allocation3], 4294966272 }
  0x24   :  { %528 = dma.done.wait [#allocation5], 1024  }
  0x25   :  { %529 = vsyncadd [#allocation5], 4294966272  ;;  %v534_v0 = vmov 0.0   ;;  %vm535_vm0 = vmmov 0   ;;  %v465_v1 = vld [vmem:[%s655_s1] sm:$0xff]   ;;  %vm77_vm1 = vcmask 130048  }
  0x26   :  { %413 = vmatprep.subr.bf16.mxu0 %v534_v0  ;;  %415 = vmatprep.mubr.msk.bf16.mxu0 %vm535_vm0, %v534_v0  ;;  %v61_v2 = vld [vmem:[%s654_s0] sm:$0xf]  ;;  %v466_v3 = vld [vmem:[#allocation2] sm:$0xff]   ;;  %v468_v5 = vld [vmem:[#allocation2 + $0x10] sm:$0xff]  }
  0x27   :  { %419 = vmatprep.subr.bf16.mxu1 %v534_v0  ;;  %435 = vmatprep.mubr.msk.bf16.mxu1 %vm535_vm0, %v534_v0  ;;  %v467_v4 = vld [vmem:[#allocation2 + $0x8] sm:$0xff]   ;;  %v469_v6 = vld [vmem:[#allocation2 + $0x18] sm:$0xff]   ;;  %v470_v7 = vld [vmem:[#allocation2 + $0x20] sm:$0xff]  }
  0x28   :  { %414 = vmatpush3.bf16.msra.mxu0 %v465_v1  ;;  %420 = vmatpush3.bf16.msra.mxu1 %v466_v3  ;;  %v471_v8 = vld [vmem:[#allocation2 + $0x28] sm:$0xff]   ;;  %v472_v9 = vld [vmem:[#allocation2 + $0x30] sm:$0xff]   ;;  %v473_v10 = vld [vmem:[#allocation2 + $0x38] sm:$0xff]  }
  0x29   :  { %439 = vmatprep.subr.bf16.mxu0 %v534_v0  ;;  %421 = vmatprep.subr.bf16.mxu1 %v534_v0  ;;  %v474_v11 = vld [vmem:[#allocation4] sm:$0xff]   ;;  %v475_v12 = vld [vmem:[#allocation4 + $0x8] sm:$0xff]   ;;  %v476_v13 = vld [vmem:[#allocation4 + $0x10] sm:$0xff]  }
  0x2a   :  { %v477_v14 = vld [vmem:[#allocation4 + $0x18] sm:$0xff]   ;;  %v478_v15 = vld [vmem:[#allocation4 + $0x20] sm:$0xff]   ;;  %v479_v16 = vld [vmem:[#allocation4 + $0x28] sm:$0xff]  }
  0x2b   :  { %416 = vmatmul.mubr.msk.bf16.vlgmr.msra.gmra.mrb[0].mxu0 %vm77_vm1, %v61_v2  ;;  %v370_v17 = vld [vmem:[%s656_s2] ss:$0 sm:$0xff]  ;;  %v480_v25 = vld [vmem:[#allocation4 + $0x30] sm:$0xff]   ;;  %v481_v26 = vld [vmem:[#allocation4 + $0x38] sm:$0xff]  }
  0x2c   :  { %455 = vmatprep.mubr.msk.bf16.mxu0 %vm535_vm0, %v534_v0  ;;  %422 = vmatpush3.bf16.msra.mxu1 %v467_v4  ;;  %v373_v27 = vld [vmem:[%s658_s4] ss:$0 sm:$0xff] }
  0x2d   :  { %423 = vmatprep.subr.bf16.mxu1 %v534_v0  ;;  %440 = vmatpush3.bf16.msra.mxu0 %v474_v11  ;;  %v382_v35 = vld [vmem:[%s660_s6] ss:$0 sm:$0xff] }
  0x2e   :  { %441 = vmatprep.subr.bf16.mxu0 %v534_v0  ;;  %v391_v37 = vld [vmem:[%s661_s7] ss:$0 sm:$0xff] }
  0x2f   :  { %v392_v40 = vld [vmem:[%s662_s8] ss:$0 sm:$0xff] }
  0x30   :  { %424 = vmatpush3.bf16.msra.mxu1 %v468_v5 }
  0x31   :  { %425 = vmatprep.subr.bf16.mxu1 %v534_v0  ;;  %442 = vmatpush3.bf16.msra.mxu0 %v475_v12 }
  0x32   :  { %443 = vmatprep.subr.bf16.mxu0 %v534_v0 }
  0x34   :  { %426 = vmatpush3.bf16.msra.mxu1 %v469_v6 }
  0x35   :  { %427 = vmatprep.subr.bf16.mxu1 %v534_v0  ;;  %444 = vmatpush3.bf16.msra.mxu0 %v476_v13 }
  0x36   :  { %445 = vmatprep.subr.bf16.mxu0 %v534_v0 }
  0x38   :  { %428 = vmatpush3.bf16.msra.mxu1 %v470_v7 }
  0x39   :  { %429 = vmatprep.subr.bf16.mxu1 %v534_v0  ;;  %446 = vmatpush3.bf16.msra.mxu0 %v477_v14 }
  0x3a   :  { %447 = vmatprep.subr.bf16.mxu0 %v534_v0 }
  0x3c   :  { %430 = vmatpush3.bf16.msra.mxu1 %v471_v8 }
  0x3d   :  { %431 = vmatprep.subr.bf16.mxu1 %v534_v0  ;;  %448 = vmatpush3.bf16.msra.mxu0 %v478_v15 }
  0x3e   :  { %449 = vmatprep.subr.bf16.mxu0 %v534_v0 }
  0x40   :  { %432 = vmatpush3.bf16.msra.mxu1 %v472_v9 }
  0x41   :  { %433 = vmatprep.subr.bf16.mxu1 %v534_v0  ;;  %450 = vmatpush3.bf16.msra.mxu0 %v479_v16 }
  0x42   :  { %451 = vmatprep.subr.bf16.mxu0 %v534_v0 }
  0x44   :  { %434 = vmatpush3.bf16.msra.mxu1 %v473_v10 }
  0x45   :  { %452 = vmatpush3.bf16.msra.mxu0 %v480_v25 }
  0x46   :  { %453 = vmatprep.subr.bf16.mxu0 %v534_v0 }
  0x49   :  { %454 = vmatpush3.bf16.msra.mxu0 %v481_v26 }
  0xfe   :  { %v115_v18 = vpop.f32.mrb[0].mxu0 }
  0xff   :  { %v116_v19 = vadd.f32 %v370_v17, %v115_v18  ;;  %v417_v20 = vpop.f32.mrb[1].mxu0 }
 0x100   :  { %v118_v21 = vpop.f32.mrb[2].mxu0 }
 0x101   :  { %v121_v22 = vmax.f32 %v116_v19, 0.0  ;;  %v418_v23 = vpop.f32.mrb[3].mxu0 }
 0x103   :  { %v122_v24 = vpack.c.bf16 %v121_v22, %v121_v22 }
 0x105   :  { %436 = vmatmul.mubr.bf16.vlgmr.msra.gmra.mrb[0].mxu1 %v122_v24 }
 0x1d8   :  { %v228_v28 = vpop.f32.mrb[0].mxu1 }
 0x1d9   :  { %v229_v29 = vadd.f32 %v373_v27, %v228_v28  ;;  %v437_v30 = vpop.f32.mrb[1].mxu1 }
 0x1da   :  { %v231_v31 = vpop.f32.mrb[2].mxu1 }
 0x1db   :  { %v234_v32 = vmax.f32 %v229_v29, 0.0  ;;  %v438_v33 = vpop.f32.mrb[3].mxu1 }
 0x1dd   :  { %v235_v34 = vpack.c.bf16 %v234_v32, %v234_v32 }
 0x1df   :  { %456 = vmatmul.mubr.bf16.vlgmr.msra.gmra.mrb[4].mxu0 %v235_v34 }
 0x2b2   :  { %v341_v36 = vpop.f32.mrb[4].mxu0 }
 0x2b3   :  { %v342_v38 = vadd.f32 %v382_v35, %v341_v36  ;;  %v457_v39 = vpop.f32.mrb[5].mxu0 }
 0x2b4   :  { %v344_v41 = vpop.f32.mrb[6].mxu0 }
 0x2b5   :  { %v354_v42 = vmax.f32 %v342_v38, %v391_v37  ;;  %v458_v43 = vpop.f32.mrb[7].mxu0 }
 0x2b7   :  { %v362_v44 = vmin.f32 %v354_v42, %v392_v40 }
 0x2b9   :  { %363 = vst [vmem:[%s663_s9] sm:$0xff] %v362_v44 }
 0x2ba   :  { %368 = vsyncpa [#allocation3], 1 }
 0x2bb   :  { %369 = vsyncpa [#allocation5], 1 }

</bundles_post_ra>
